<compile_context>
chip_gen: v7x
topology: tpu7x:2x2x1
jax: 0.10.0
libtpu: 0.0.40
codegen_flags: <defaults>
</compile_context>

<pallas_src>
import functools

import jax
import jax.numpy as jnp
from jax.experimental import pallas as pl
from jax.experimental.pallas import tpu as pltpu


_VMEM_LIMIT_BYTES = 48 << 20          # < 64 MiB physical on v7x, plenty on v5e/v6e
_DEFAULT_BLOCK_BUDGET = 24 << 20      # double-buffered input block budget


def _round_up(n, m):
    return ((n + m - 1) // m) * m


# ---------------------------------------------------------------------------
# Preferred path: full-row blocks.  grid = (B // tb,), no reduction axis,
# no scratch, no init/finalize.
# ---------------------------------------------------------------------------
def _fullrow_kernel(inv_f, x_ref, o_ref):
    # x_ref: (tb, F) in VMEM ; o_ref: (tb, 1) in VMEM
    x = jnp.maximum(x_ref[...].astype(jnp.float32), 0.0)          # torch.relu
    # mean(cat((x, x), 1), 1) == mean(x, 1) == sum(x, 1) * (1/F)
    o_ref[...] = (jnp.sum(x, axis=1, keepdims=True) * inv_f).astype(o_ref.dtype)


def _relu_mean_fullrow(x2d, tb, inv_f):
    B, F = x2d.shape                   # already padded: B % tb == 0, F % 128 == 0
    return pl.pallas_call(
        functools.partial(_fullrow_kernel, inv_f),
        out_shape=jax.ShapeDtypeStruct((B, 1), jnp.float32),
        grid_spec=pltpu.PrefetchScalarGridSpec(
            num_scalar_prefetch=0,
            grid=(B // tb,),
            in_specs=[pl.BlockSpec((tb, F), lambda i: (i, 0))],
            out_specs=pl.BlockSpec((tb, 1), lambda i: (i, 0)),
        ),
        compiler_params=pltpu.CompilerParams(
            dimension_semantics=("parallel",),
            vmem_limit_bytes=_VMEM_LIMIT_BYTES,
        ),
        cost_estimate=pl.CostEstimate(
            flops=2 * B * F, transcendentals=0,
            bytes_accessed=B * F * 4 + B * 4),
    )(x2d)


# ---------------------------------------------------------------------------
# Fallback path for very wide rows: tiled reduction over F (last grid axis),
# lane-dense (tb, 128) accumulator, single cross-lane reduce at finalize.
# ---------------------------------------------------------------------------
def _ktiled_kernel(inv_f, n_lane_tiles, x_ref, o_ref, acc_ref):
    k = pl.program_id(1)

    @pl.when(k == 0)
    def _():
        acc_ref[...] = jnp.zeros_like(acc_ref)

    x = jnp.maximum(x_ref[...].astype(jnp.float32), 0.0)          # (tb, tf)
    # Fold tf lanes into a lane-dense (tb, 128) partial sum with pure VPU adds
    # (static 128-aligned lane slices); defer the XLU cross-lane reduce.
    s = x[:, 0:128]
    for j in range(1, n_lane_tiles):
        s = s + x[:, j * 128:(j + 1) * 128]
    acc_ref[...] += s

    @pl.when(k == pl.num_programs(1) - 1)
    def _():
        o_ref[...] = (jnp.sum(acc_ref[...], axis=1, keepdims=True)
                      * inv_f).astype(o_ref.dtype)


def _relu_mean_ktiled(x2d, tb, tf, inv_f):
    B, F = x2d.shape                   # already padded: B % tb == 0, F % tf == 0
    return pl.pallas_call(
        functools.partial(_ktiled_kernel, inv_f, tf // 128),
        out_shape=jax.ShapeDtypeStruct((B, 1), jnp.float32),
        grid_spec=pltpu.PrefetchScalarGridSpec(
            num_scalar_prefetch=0,
            grid=(B // tb, F // tf),
            in_specs=[pl.BlockSpec((tb, tf), lambda i, k: (i, k))],
            out_specs=pl.BlockSpec((tb, 1), lambda i, k: (i, 0)),
            scratch_shapes=[pltpu.VMEM((tb, 128), jnp.float32)],
        ),
        compiler_params=pltpu.CompilerParams(
            dimension_semantics=("parallel", "arbitrary"),
            vmem_limit_bytes=_VMEM_LIMIT_BYTES,
        ),
        cost_estimate=pl.CostEstimate(
            flops=2 * B * F, transcendentals=0,
            bytes_accessed=B * F * 4 + B * 4),
    )(x2d)


# ---------------------------------------------------------------------------
# Tile selection + wrapper
# ---------------------------------------------------------------------------
def _choose_tiles(B, F, budget_bytes):
    # Batch tile: keep >= 2 blocks along the "parallel" batch axis once the
    # batch is big enough, so both v7x TensorCores get work.
    if B <= 16:
        tb = 8
    elif B <= 64:
        tb = 16
    elif B <= 256:
        tb = 128
    else:
        tb = 256
    f_pad = _round_up(F, 128)
    if 2 * tb * f_pad * 4 <= budget_bytes:
        tf = f_pad                     # full-row block: one contiguous DMA per step
    else:
        tf = max(128, min(4096, (budget_bytes // (2 * tb * 4)) // 128 * 128))
        f_pad = _round_up(F, tf)
    b_pad = _round_up(B, tb)
    return tb, tf, b_pad, f_pad


def model_forward(x, *, block_budget_bytes=_DEFAULT_BLOCK_BUDGET):
    """x: (B, ...) -> (B, 1) float32, matching the PyTorch Model forward."""
    B = x.shape[0]
    x2d = x.reshape(B, -1).astype(jnp.float32)   # torch .view(B, -1)
    F = x2d.shape[1]
    inv_f = 1.0 / float(F)             # mean(cat((x, x), 1), 1) == mean(x, 1)

    tb, tf, b_pad, f_pad = _choose_tiles(B, F, block_budget_bytes)
    if (b_pad, f_pad) != (B, F):
        # relu(0) == 0 => zero padding leaves every row sum unchanged.
        x2d = jnp.pad(x2d, ((0, b_pad - B), (0, f_pad - F)))

    if tf == f_pad:
        out = _relu_mean_fullrow(x2d, tb, inv_f)
    else:
        out = _relu_mean_ktiled(x2d, tb, tf, inv_f)
    return out[:B] if b_pad != B else out


def _reference(x):
    B = x.shape[0]
    r = jnp.maximum(x.reshape(B, -1).astype(jnp.float32), 0.0)
    return jnp.mean(jnp.concatenate((r, r), axis=1), axis=1, keepdims=True)


if __name__ == "__main__":
    key = jax.random.PRNGKey(0)

    # 1) The module's shape: (2, 3, 4) -> padded to one (8, 128) full-row block.
    x = jax.random.normal(key, (2, 3, 4), dtype=jnp.float32)
    out = model_forward(x)
    jax.block_until_ready(out)
    assert out.shape == (2, 1)
    assert jnp.allclose(out, _reference(x), atol=1e-6)

    # 2) Larger aligned shape: full-row path, 2 batch blocks (tb=128).
    xb = jax.random.normal(jax.random.PRNGKey(1), (256, 4096), dtype=jnp.float32)
    outb = model_forward(xb)
    jax.block_until_ready(outb)
    assert jnp.allclose(outb, _reference(xb), atol=1e-5, rtol=1e-5)

    # 3) Ragged shape: exercises zero-padding on both axes.
    xr = jax.random.normal(jax.random.PRNGKey(2), (10, 1000), dtype=jnp.float32)
    outr = model_forward(xr)
    jax.block_until_ready(outr)
    assert outr.shape == (10, 1)
    assert jnp.allclose(outr, _reference(xr), atol=1e-5, rtol=1e-5)

    # 4) Force the k-tiled reduction path with a tiny block budget.
    xk = jax.random.normal(jax.random.PRNGKey(3), (64, 2048), dtype=jnp.float32)
    outk = model_forward(xk, block_budget_bytes=128 << 10)
    jax.block_until_ready(outk)
    assert jnp.allclose(outk, _reference(xk), atol=1e-5, rtol=1e-5)

    print("KERNEL_OK")
</pallas_src>

<mosaic_0001>
module attributes {stable_mosaic.version = 11 : i64} {
  func.func @_fullrow_kernel(%arg0: i32, %arg1: memref<8x128xf32, #tpu.memory_space<vmem>>, %arg2: memref<8x1xf32, #tpu.memory_space<vmem>>) attributes {dimension_semantics = [#tpu.dimension_semantics<parallel>], iteration_bounds = array<i64: 1>, scalar_prefetch = 0 : i64, scratch_operands = 0 : i64, tpu.core_type = #tpu.core_type<tc>, window_params = [{transform_indices = @transform_0, window_bounds = array<i64: 8, 128>}, {transform_indices = @transform_1, window_bounds = array<i64: 8, 1>}]} {
    %c0 = arith.constant 0 : index
    %c0_0 = arith.constant 0 : index
    %0 = vector.load %arg1[%c0, %c0_0] : memref<8x128xf32, #tpu.memory_space<vmem>>, vector<8x128xf32>
    %cst = arith.constant 0.000000e+00 : f32
    %1 = vector.broadcast %cst : f32 to vector<8x128xf32>
    %2 = arith.maximumf %0, %1 : vector<8x128xf32>
    %cst_1 = arith.constant dense<0.000000e+00> : vector<8xf32>
    %3 = vector.multi_reduction <add>, %2, %cst_1 [1] : vector<8x128xf32> to vector<8xf32>
    %4 = vector.shape_cast %3 : vector<8xf32> to vector<8x1xf32>
    %cst_2 = arith.constant 0.0833333358 : f32
    %5 = vector.broadcast %cst_2 : f32 to vector<8x1xf32>
    %6 = arith.mulf %4, %5 : vector<8x1xf32>
    %c0_3 = arith.constant 0 : index
    %c0_4 = arith.constant 0 : index
    %7 = vector.load %arg2[%c0_3, %c0_4] : memref<8x1xf32, #tpu.memory_space<vmem>>, vector<8x1xf32>
    tpu.vector_store %arg2[%c0_3, %c0_4], %6 {strides = array<i32>} : memref<8x1xf32, #tpu.memory_space<vmem>>, vector<8x1xf32>,
    return
  }
  func.func @transform_0(%arg0: i32) -> (i32, i32) {
    %c0_i32 = arith.constant 0 : i32
    %c0_i32_0 = arith.constant 0 : i32
    return %arg0, %c0_i32 : i32, i32
  }
  func.func @transform_1(%arg0: i32) -> (i32, i32) {
    %c0_i32 = arith.constant 0 : i32
    %c0_i32_0 = arith.constant 0 : i32
    return %arg0, %c0_i32 : i32, i32
  }
}

</mosaic_0001>

<bundles_post_ra>
// kernel: tpu_custom_call.1
= control target key start
LH: loop header
LB: loop body
LE: loop exit
PB: predicated region body
PF: predicated region fallthrough
CT: control target
= control target key end

     0   :  { %6 = vsyncpa [#allocation3], 0  ;;  %s57_s6 = smov [#allocation2]   ;;  %s83_s0 = inlined_call_operand.hbm [shape: f32[8,128], index: 0, kind: input, shape index: {}]   ;;  %s84_s1 = inlined_call_operand.vmem [shape: f32[8,1], index: 1, kind: output, shape index: {}]  }
   0x1   :  { %s13_s7 = sshll.u32 %s57_s6, 4  ;;  %s33_s10 = scalar_lea.hbm %s83_s0, 128  ;;  %s14_s7 = int_to_ptr.vmem [resolvable:$true] %s13_s7 }
   0x2   :  { %p34_p0 = scmp.ne.s32.totalorder %s83_s0, %s33_s10  ;;  %p37_p1 = scmp.lt.u32.totalorder %s33_s10, %s83_s0 }
   0x4   :  { %p39_p2 = pnand %p37_p1, %p34_p0 }
   0x6   :  { %42 = shalt.err (!%p39_p2)
}
   0x7   :  { %s43_s15 = scalar_lea.vmem %s14_s7, 128  ;;  %p48_p4 = scmp.lt.s32.totalorder %s14_s7, %s14_s7 }
   0x8   :  { %p44_p3 = scmp.ne.s32.totalorder %s14_s7, %s43_s15  ;;  %p49_p5 = scmp.lt.s32.totalorder %s43_s15, %s43_s15 }
   0xa   :  { %p50_p6 = por %p49_p5, %p48_p4 }
   0xc   :  { %p51_p7 = pnand %p50_p6, %p44_p3 }
   0xe   :  { %54 = shalt.err (!%p51_p7)
}
   0xf   :  { %16 = dma.hbm_to_vmem [thread:$0]  %s83_s0, 128, %s14_s7, [#allocation3]  }
  0x10   :  { %55 = dma.done.wait [#allocation3], 128  }
  0x11   :  { %56 = vsyncadd [#allocation3], 4294967168  ;;  %v20_v0 = vld [vmem:[#allocation2] sm:$0xff]  ;;  %vm25_vm0 = vcmask 7168  }
  0x12   :  { %v21_v1 = vmax.f32 %v20_v0, 0.0 }
  0x14   :  { %22 = vadd.xlane.f32.xlu0 %v21_v1 }
  0xa1   :  { %v23_v2 = vpop.xlane.xlu0 %22 }
  0xa2   :  { %v24_v3 = vmul.f32 0.083333336, %v23_v2 }
  0xa4   :  { %26 = vst.msk [vmem:[%s84_s1] sm:$0xff] %vm25_vm0, %v24_v3 }
  0xa5   :  { %31 = vsyncpa [#allocation3], 1 }

</bundles_post_ra>
